<compile_context>
chip_gen: v7x
topology: tpu7x:2x2x1
jax: 0.10.0
libtpu: 0.0.40
codegen_flags: <defaults>
</compile_context>

<pallas_src>
import math

import jax
import jax.numpy as jnp
from jax.experimental import pallas as pl
from jax.experimental.pallas import tpu as pltpu


# ---------------------------------------------------------------------------
# Kernels
# ---------------------------------------------------------------------------

def _noisy_split_kernel(x_ref, xeps_ref, wmu_ref, wsig_ref, eout_ref,
                        bmu_ref, bsig_ref, o_ref, acc_mu_ref, acc_sig_ref):
    """Training mode, streaming form (default for small/medium batch).

    y = x @ wmu_t + ((x * eps_in) @ wsig_t) * eps_out + (bmu + bsig * eps_out)

    x_eps is precomputed in the wrapper; the hot loop is two pure MXU matmuls
    with no per-K-step VPU tile work.  eps_out / bias applied at finalize only.
    Weight / activation tiles arrive already in the MXU dtype.
    """
    k = pl.program_id(2)

    @pl.when(k == 0)
    def _():
        acc_mu_ref[...] = jnp.zeros_like(acc_mu_ref)
        acc_sig_ref[...] = jnp.zeros_like(acc_sig_ref)

    acc_mu_ref[...] += jnp.dot(x_ref[...], wmu_ref[...],
                               preferred_element_type=jnp.float32)
    acc_sig_ref[...] += jnp.dot(xeps_ref[...], wsig_ref[...],
                                preferred_element_type=jnp.float32)

    @pl.when(k == pl.num_programs(2) - 1)
    def _():
        eout = eout_ref[...]                                  # (1, tn) f32
        b = bmu_ref[...] + bsig_ref[...] * eout               # (1, tn) f32
        o_ref[...] = (acc_mu_ref[...] + acc_sig_ref[...] * eout + b
                      ).astype(o_ref.dtype)


def _noisy_fused_kernel(x_ref, wmu_ref, wsig_ref, ein_ref, eout_ref,
                        bmu_ref, bsig_ref, o_ref, acc_ref):
    """Training mode, single-matmul form (for large batch where MXU binds).

    Rebuilds the effective noisy weight tile from the rank-1 noise on the VPU:
    w = wmu + wsig * (eps_in[:,None] * eps_out[None,:]) in [in, out] layout.
    """
    k = pl.program_id(2)

    @pl.when(k == 0)
    def _():
        acc_ref[...] = jnp.zeros_like(acc_ref)

    eps = (ein_ref[...] * eout_ref[...]).astype(wmu_ref.dtype)  # (tk,1)*(1,tn)
    w = wmu_ref[...] + wsig_ref[...] * eps
    acc_ref[...] += jnp.dot(x_ref[...], w, preferred_element_type=jnp.float32)

    @pl.when(k == pl.num_programs(2) - 1)
    def _():
        b = bmu_ref[...] + bsig_ref[...] * eout_ref[...]       # (1, tn) f32
        o_ref[...] = (acc_ref[...] + b).astype(o_ref.dtype)


def _mean_kernel(x_ref, wmu_ref, bmu_ref, o_ref, acc_ref):
    """Eval mode: y = x @ weight_mu.T + bias_mu (weights pre-transposed to [in,out])."""
    k = pl.program_id(2)

    @pl.when(k == 0)
    def _():
        acc_ref[...] = jnp.zeros_like(acc_ref)

    acc_ref[...] += jnp.dot(x_ref[...], wmu_ref[...],
                            preferred_element_type=jnp.float32)

    @pl.when(k == pl.num_programs(2) - 1)
    def _():
        o_ref[...] = (acc_ref[...] + bmu_ref[...]).astype(o_ref.dtype)


# ---------------------------------------------------------------------------
# Wrapper helpers
# ---------------------------------------------------------------------------

def _round_up(x, m):
    return ((x + m - 1) // m) * m


def _largest_tile(extent, align, cap):
    """Largest t <= cap that is a multiple of `align` and divides `extent`.
    `extent` must already be a multiple of `align` (so `align` always works)."""
    cap = max(align, min(cap, extent))
    t = (cap // align) * align
    while t > align and extent % t != 0:
        t -= align
    return t


def prepare_noisy_linear_params(weight_mu, weight_sigma, bias_mu, bias_sigma,
                                eps_in, eps_out, mxu_dtype=jnp.float32):
    """One-time transpose / pad / cast of the NoisyLinear parameters.

    Cache the returned dict across forward calls; it depends only on the
    parameters and the chosen MXU dtype (not on the batch size), so the
    per-call HBM read+write of a full weight transpose is paid once.
    """
    out_f, in_f = weight_mu.shape
    Kp = _round_up(in_f, 128)    # lane axis of x / sublane axis of the weights
    Np = _round_up(out_f, 128)   # lane axis of weights & output (lane-dense stores)

    def pad_w(w):                # [out, in] -> [in, out], zero-padded, MXU dtype
        return jnp.pad(w.T.astype(mxu_dtype), ((0, Kp - in_f), (0, Np - out_f)))

    def pad_row(v):              # [out] -> [1, Np], kept f32
        return jnp.pad(v.astype(jnp.float32).reshape(1, out_f),
                       ((0, 0), (0, Np - out_f)))

    return dict(
        in_features=in_f, out_features=out_f, Kp=Kp, Np=Np,
        mxu_dtype=jnp.dtype(mxu_dtype),
        wmu_t=pad_w(weight_mu),
        wsig_t=pad_w(weight_sigma),
        bmu2=pad_row(bias_mu),
        bsig2=pad_row(bias_sigma),
        eout2=pad_row(eps_out),
        eps_in=eps_in.astype(jnp.float32),                       # for x * eps_in
        ein2=jnp.pad(eps_in.astype(jnp.float32).reshape(in_f, 1),
                     ((0, Kp - in_f), (0, 0))),                  # fused path only
    )


def noisy_linear_forward(x, params, training=True, fused_batch_threshold=512,
                         w_buffers=2):
    """Pallas NoisyLinear forward.  `params` comes from prepare_noisy_linear_params."""
    B, in_f = x.shape
    assert in_f == params["in_features"]
    out_f, Kp, Np = params["out_features"], params["Kp"], params["Np"]
    mxu_dtype = params["mxu_dtype"]
    out_dtype = x.dtype
    itm = jnp.dtype(mxu_dtype).itemsize

    # 16-bit MXU operands pack 16 rows per sublane tile -> round tm to 16.
    sub = 16 if itm == 2 else 8
    Mp = _round_up(B, sub)

    # Tiles are divisors of the (8/16,128)-rounded extents: no tile-multiple padding.
    tm = _largest_tile(Mp, sub, 512)
    tn = _largest_tile(Np, 128, 512)
    tk = _largest_tile(Kp, 128, 2048 if itm == 2 else 1024)

    # v7x has 2 TensorCores; give the parallel (M, N) grid >= 2 blocks when possible.
    if (Mp // tm) * (Np // tn) < 2:
        if tn % 256 == 0:
            tn //= 2
        elif tm % (2 * sub) == 0:
            tm //= 2

    grid = (Mp // tm, Np // tn, Kp // tk)

    # Activation stream(s): pad + cast once per call (tiny vs. the weight streams).
    xp = jnp.pad(x.astype(mxu_dtype), ((0, Mp - B), (0, Kp - in_f)))

    x_spec = pl.BlockSpec((tm, tk), lambda i, j, k: (i, k))
    w_kwargs = {}
    if w_buffers and w_buffers > 2:       # optional deeper pipelining on weights
        w_kwargs["pipeline_mode"] = pl.Buffered(w_buffers)
    w_spec = pl.BlockSpec((tk, tn), lambda i, j, k: (k, j), **w_kwargs)
    b_spec = pl.BlockSpec((1, tn), lambda i, j, k: (0, j))
    o_spec = pl.BlockSpec((tm, tn), lambda i, j, k: (i, j))
    out_shape = jax.ShapeDtypeStruct((Mp, Np), out_dtype)

    use_fused = bool(training) and B >= fused_batch_threshold
    n_x = 2 if (training and not use_fused) else 1
    n_w = 2 if training else 1
    n_acc = 2 if (training and not use_fused) else 1
    footprint = (2 * n_x * tm * tk * itm            # double-buffered activation tiles
                 + 2 * n_w * tk * tn * itm          # double-buffered weight tiles
                 + n_acc * tm * tn * 4              # f32 accumulators
                 + 2 * tm * tn * jnp.dtype(out_dtype).itemsize   # output buffers
                 + 8 * tn * 4 + 2 * tk * 4)         # bias / eps rows
    vmem_limit = int(min(max(footprint + (8 << 20), 32 << 20), 48 << 20))

    compiler_params = pltpu.CompilerParams(
        dimension_semantics=("parallel", "parallel", "arbitrary"),
        vmem_limit_bytes=vmem_limit)

    if not training:
        yp = pl.pallas_call(
            _mean_kernel,
            out_shape=out_shape,
            grid_spec=pltpu.PrefetchScalarGridSpec(
                num_scalar_prefetch=0, grid=grid,
                in_specs=[x_spec, w_spec, b_spec],
                out_specs=o_spec,
                scratch_shapes=[pltpu.VMEM((tm, tn), jnp.float32)]),
            compiler_params=compiler_params,
        )(xp, params["wmu_t"], params["bmu2"])
    elif use_fused:
        ein_spec = pl.BlockSpec((tk, 1), lambda i, j, k: (k, 0))
        yp = pl.pallas_call(
            _noisy_fused_kernel,
            out_shape=out_shape,
            grid_spec=pltpu.PrefetchScalarGridSpec(
                num_scalar_prefetch=0, grid=grid,
                in_specs=[x_spec, w_spec, w_spec, ein_spec, b_spec, b_spec, b_spec],
                out_specs=o_spec,
                scratch_shapes=[pltpu.VMEM((tm, tn), jnp.float32)]),
            compiler_params=compiler_params,
        )(xp, params["wmu_t"], params["wsig_t"], params["ein2"],
          params["eout2"], params["bmu2"], params["bsig2"])
    else:
        # Split form: x_eps = x * eps_in in the wrapper, pure streaming matmuls in-kernel.
        xeps = jnp.pad(
            (x.astype(jnp.float32) * params["eps_in"][None, :]).astype(mxu_dtype),
            ((0, Mp - B), (0, Kp - in_f)))
        yp = pl.pallas_call(
            _noisy_split_kernel,
            out_shape=out_shape,
            grid_spec=pltpu.PrefetchScalarGridSpec(
                num_scalar_prefetch=0, grid=grid,
                in_specs=[x_spec, x_spec, w_spec, w_spec, b_spec, b_spec, b_spec],
                out_specs=o_spec,
                scratch_shapes=[pltpu.VMEM((tm, tn), jnp.float32),
                                pltpu.VMEM((tm, tn), jnp.float32)]),
            compiler_params=compiler_params,
        )(xp, xeps, params["wmu_t"], params["wsig_t"],
          params["eout2"], params["bmu2"], params["bsig2"])

    return yp[:B, :out_f]


# ---------------------------------------------------------------------------
# Parameter / noise initialization (mirrors reset_parameters / reset_noise)
# ---------------------------------------------------------------------------

def _scale_noise(key, size):
    """x.sign() * sqrt(|x|) with x ~ N(0, 1)."""
    x = jax.random.normal(key, (size,), dtype=jnp.float32)
    return jnp.sign(x) * jnp.sqrt(jnp.abs(x))


def init_noisy_linear(key, in_features, out_features, std_init=0.5):
    # TODO(synk): reset_noise()/_scale_noise() RNG stays host-side JAX glue (not a Pallas kernel).
    k_wmu, k_bmu, k_ein, k_eout = jax.random.split(key, 4)
    mu_range = 1.0 / math.sqrt(in_features)

    weight_mu = jax.random.uniform(k_wmu, (out_features, in_features),
                                   minval=-mu_range, maxval=mu_range,
                                   dtype=jnp.float32)
    bias_mu = jax.random.uniform(k_bmu, (out_features,),
                                 minval=-mu_range, maxval=mu_range,
                                 dtype=jnp.float32)
    weight_sigma = jnp.full((out_features, in_features),
                            std_init / math.sqrt(in_features), jnp.float32)
    bias_sigma = jnp.full((out_features,),
                          std_init / math.sqrt(out_features), jnp.float32)

    eps_in = _scale_noise(k_ein, in_features)     # factorised noise vectors
    eps_out = _scale_noise(k_eout, out_features)  # weight_epsilon = outer(eps_out, eps_in)

    return weight_mu, weight_sigma, bias_mu, bias_sigma, eps_in, eps_out


if __name__ == "__main__":
    B, IN_F, OUT_F = 8, 32, 16

    key = jax.random.PRNGKey(0)
    k_params, k_x = jax.random.split(key)

    (weight_mu, weight_sigma, bias_mu, bias_sigma,
     eps_in, eps_out) = init_noisy_linear(k_params, IN_F, OUT_F)

    x = jax.random.normal(k_x, (B, IN_F), dtype=jnp.float32)

    # Prepared (transposed / padded / cast) params, built once and reused across calls.
    params_f32 = prepare_noisy_linear_params(weight_mu, weight_sigma, bias_mu,
                                             bias_sigma, eps_in, eps_out,
                                             mxu_dtype=jnp.float32)
    params_bf16 = prepare_noisy_linear_params(weight_mu, weight_sigma, bias_mu,
                                              bias_sigma, eps_in, eps_out,
                                              mxu_dtype=jnp.bfloat16)

    # Training-mode forward: split (two streaming matmuls) form, f32 MXU path.
    y_train = jax.block_until_ready(
        noisy_linear_forward(x, params_f32, training=True))

    # Training-mode forward forced onto the fused single-matmul (large-batch) form.
    y_fused = jax.block_until_ready(
        noisy_linear_forward(x, params_f32, training=True, fused_batch_threshold=1))

    # Eval-mode forward (mean parameters).
    y_eval = jax.block_until_ready(
        noisy_linear_forward(x, params_f32, training=False))

    # bf16 weight/activation streaming (the fast path on v6e/v7x); f32 accumulation.
    y_bf16 = jax.block_until_ready(
        noisy_linear_forward(x, params_bf16, training=True))

    # Pure-JAX reference (matches the PyTorch NoisyLinear semantics).
    weight_eps = jnp.outer(eps_out, eps_in)
    w_eff = weight_mu + weight_sigma * weight_eps
    b_eff = bias_mu + bias_sigma * eps_out
    ref_train = x @ w_eff.T + b_eff
    ref_eval = x @ weight_mu.T + bias_mu

    assert y_train.shape == (B, OUT_F)
    assert y_eval.shape == (B, OUT_F)
    assert jnp.allclose(y_train, ref_train, atol=1e-5, rtol=1e-5)
    assert jnp.allclose(y_fused, ref_train, atol=1e-5, rtol=1e-5)
    assert jnp.allclose(y_eval, ref_eval, atol=1e-5, rtol=1e-5)
    assert jnp.allclose(y_bf16, ref_train, atol=5e-2, rtol=5e-2)

    print("KERNEL_OK")
</pallas_src>

<mosaic_0001>
module attributes {stable_mosaic.version = 11 : i64} {
  func.func @_noisy_split_kernel(%arg0: i32, %arg1: i32, %arg2: i32, %arg3: memref<8x128xf32, #tpu.memory_space<vmem>>, %arg4: memref<8x128xf32, #tpu.memory_space<vmem>>, %arg5: memref<128x128xf32, #tpu.memory_space<vmem>>, %arg6: memref<128x128xf32, #tpu.memory_space<vmem>>, %arg7: memref<1x128xf32, #tpu.memory_space<vmem>>, %arg8: memref<1x128xf32, #tpu.memory_space<vmem>>, %arg9: memref<1x128xf32, #tpu.memory_space<vmem>>, %arg10: memref<8x128xf32, #tpu.memory_space<vmem>>, %arg11: memref<8x128xf32, #tpu.memory_space<vmem>>, %arg12: memref<8x128xf32, #tpu.memory_space<vmem>>) attributes {dimension_semantics = [#tpu.dimension_semantics<parallel>, #tpu.dimension_semantics<parallel>, #tpu.dimension_semantics<arbitrary>], iteration_bounds = array<i64: 1, 1, 1>, scalar_prefetch = 0 : i64, scratch_operands = 2 : i64, tpu.core_type = #tpu.core_type<tc>, window_params = [{transform_indices = @transform_0, window_bounds = array<i64: 8, 128>}, {transform_indices = @transform_1, window_bounds = array<i64: 8, 128>}, {transform_indices = @transform_2, window_bounds = array<i64: 128, 128>}, {transform_indices = @transform_3, window_bounds = array<i64: 128, 128>}, {transform_indices = @transform_4, window_bounds = array<i64: 1, 128>}, {transform_indices = @transform_5, window_bounds = array<i64: 1, 128>}, {transform_indices = @transform_6, window_bounds = array<i64: 1, 128>}, {transform_indices = @transform_7, window_bounds = array<i64: 8, 128>}]} {
    %c0_i32 = arith.constant 0 : i32
    %0 = arith.cmpi eq, %arg2, %c0_i32 : i32
    %1 = arith.extui %0 : i1 to i32
    %c0_i32_0 = arith.constant 0 : i32
    %2 = arith.cmpi ne, %1, %c0_i32_0 : i32
    scf.if %2 {
      %cst_19 = arith.constant 0.000000e+00 : f32
      %18 = vector.broadcast %cst_19 : f32 to vector<8x128xf32>
      %c0_20 = arith.constant 0 : index
      %c0_21 = arith.constant 0 : index
      %19 = vector.load %arg11[%c0_20, %c0_21] : memref<8x128xf32, #tpu.memory_space<vmem>>, vector<8x128xf32>
      tpu.vector_store %arg11[%c0_20, %c0_21], %18 {strides = array<i32>} : memref<8x128xf32, #tpu.memory_space<vmem>>, vector<8x128xf32>,
      %cst_22 = arith.constant 0.000000e+00 : f32
      %20 = vector.broadcast %cst_22 : f32 to vector<8x128xf32>
      %c0_23 = arith.constant 0 : index
      %c0_24 = arith.constant 0 : index
      %21 = vector.load %arg12[%c0_23, %c0_24] : memref<8x128xf32, #tpu.memory_space<vmem>>, vector<8x128xf32>
      tpu.vector_store %arg12[%c0_23, %c0_24], %20 {strides = array<i32>} : memref<8x128xf32, #tpu.memory_space<vmem>>, vector<8x128xf32>,
    } else {
    }
    %c0 = arith.constant 0 : index
    %c0_1 = arith.constant 0 : index
    %3 = vector.load %arg11[%c0, %c0_1] : memref<8x128xf32, #tpu.memory_space<vmem>>, vector<8x128xf32>
    %c0_2 = arith.constant 0 : index
    %c0_3 = arith.constant 0 : index
    %4 = vector.load %arg3[%c0_2, %c0_3] : memref<8x128xf32, #tpu.memory_space<vmem>>, vector<8x128xf32>
    %c0_4 = arith.constant 0 : index
    %c0_5 = arith.constant 0 : index
    %5 = vector.load %arg5[%c0_4, %c0_5] : memref<128x128xf32, #tpu.memory_space<vmem>>, vector<128x128xf32>
    %cst = arith.constant dense<0.000000e+00> : vector<8x128xf32>
    %6 = tpu.matmul %4, %5, %cst {dimension_numbers = #tpu.dot_dimension_numbers<[1], [0], [0], [1], [0, 0, 1, 1], [], []>} : vector<8x128xf32>, vector<128x128xf32>, vector<8x128xf32> -> vector<8x128xf32>
    %7 = arith.addf %3, %6 : vector<8x128xf32>
    %c0_6 = arith.constant 0 : index
    %c0_7 = arith.constant 0 : index
    %8 = vector.load %arg11[%c0_6, %c0_7] : memref<8x128xf32, #tpu.memory_space<vmem>>, vector<8x128xf32>
    tpu.vector_store %arg11[%c0_6, %c0_7], %7 {strides = array<i32>} : memref<8x128xf32, #tpu.memory_space<vmem>>, vector<8x128xf32>,
    %c0_8 = arith.constant 0 : index
    %c0_9 = arith.constant 0 : index
    %9 = vector.load %arg12[%c0_8, %c0_9] : memref<8x128xf32, #tpu.memory_space<vmem>>, vector<8x128xf32>
    %c0_10 = arith.constant 0 : index
    %c0_11 = arith.constant 0 : index
    %10 = vector.load %arg4[%c0_10, %c0_11] : memref<8x128xf32, #tpu.memory_space<vmem>>, vector<8x128xf32>
    %c0_12 = arith.constant 0 : index
    %c0_13 = arith.constant 0 : index
    %11 = vector.load %arg6[%c0_12, %c0_13] : memref<128x128xf32, #tpu.memory_space<vmem>>, vector<128x128xf32>
    %cst_14 = arith.constant dense<0.000000e+00> : vector<8x128xf32>
    %12 = tpu.matmul %10, %11, %cst_14 {dimension_numbers = #tpu.dot_dimension_numbers<[1], [0], [0], [1], [0, 0, 1, 1], [], []>} : vector<8x128xf32>, vector<128x128xf32>, vector<8x128xf32> -> vector<8x128xf32>
    %13 = arith.addf %9, %12 : vector<8x128xf32>
    %c0_15 = arith.constant 0 : index
    %c0_16 = arith.constant 0 : index
    %14 = vector.load %arg12[%c0_15, %c0_16] : memref<8x128xf32, #tpu.memory_space<vmem>>, vector<8x128xf32>
    tpu.vector_store %arg12[%c0_15, %c0_16], %13 {strides = array<i32>} : memref<8x128xf32, #tpu.memory_space<vmem>>, vector<8x128xf32>,
    %c0_i32_17 = arith.constant 0 : i32
    %15 = arith.cmpi eq, %arg2, %c0_i32_17 : i32
    %16 = arith.extui %15 : i1 to i32
    %c0_i32_18 = arith.constant 0 : i32
    %17 = arith.cmpi ne, %16, %c0_i32_18 : i32
    scf.if %17 {
      %c0_19 = arith.constant 0 : index
      %c0_20 = arith.constant 0 : index
      %18 = vector.load %arg7[%c0_19, %c0_20] : memref<1x128xf32, #tpu.memory_space<vmem>>, vector<1x128xf32>
      %c0_21 = arith.constant 0 : index
      %c0_22 = arith.constant 0 : index
      %19 = vector.load %arg8[%c0_21, %c0_22] : memref<1x128xf32, #tpu.memory_space<vmem>>, vector<1x128xf32>
      %c0_23 = arith.constant 0 : index
      %c0_24 = arith.constant 0 : index
      %20 = vector.load %arg9[%c0_23, %c0_24] : memref<1x128xf32, #tpu.memory_space<vmem>>, vector<1x128xf32>
      %21 = arith.mulf %20, %18 : vector<1x128xf32>
      %22 = arith.addf %19, %21 : vector<1x128xf32>
      %c0_25 = arith.constant 0 : index
      %c0_26 = arith.constant 0 : index
      %23 = vector.load %arg11[%c0_25, %c0_26] : memref<8x128xf32, #tpu.memory_space<vmem>>, vector<8x128xf32>
      %c0_27 = arith.constant 0 : index
      %c0_28 = arith.constant 0 : index
      %24 = vector.load %arg12[%c0_27, %c0_28] : memref<8x128xf32, #tpu.memory_space<vmem>>, vector<8x128xf32>
      %25 = vector.broadcast %18 : vector<1x128xf32> to vector<8x128xf32>
      %26 = arith.mulf %24, %25 : vector<8x128xf32>
      %27 = arith.addf %23, %26 : vector<8x128xf32>
      %28 = vector.broadcast %22 : vector<1x128xf32> to vector<8x128xf32>
      %29 = arith.addf %27, %28 : vector<8x128xf32>
      %c0_29 = arith.constant 0 : index
      %c0_30 = arith.constant 0 : index
      %30 = vector.load %arg10[%c0_29, %c0_30] : memref<8x128xf32, #tpu.memory_space<vmem>>, vector<8x128xf32>
      tpu.vector_store %arg10[%c0_29, %c0_30], %29 {strides = array<i32>} : memref<8x128xf32, #tpu.memory_space<vmem>>, vector<8x128xf32>,
    } else {
    }
    return
  }
  func.func @transform_0(%arg0: i32, %arg1: i32, %arg2: i32) -> (i32, i32) {
    %c0_i32 = arith.constant 0 : i32
    return %arg0, %arg2 : i32, i32
  }
  func.func @transform_1(%arg0: i32, %arg1: i32, %arg2: i32) -> (i32, i32) {
    %c0_i32 = arith.constant 0 : i32
    return %arg0, %arg2 : i32, i32
  }
  func.func @transform_2(%arg0: i32, %arg1: i32, %arg2: i32) -> (i32, i32) {
    %c0_i32 = arith.constant 0 : i32
    return %arg2, %arg1 : i32, i32
  }
  func.func @transform_3(%arg0: i32, %arg1: i32, %arg2: i32) -> (i32, i32) {
    %c0_i32 = arith.constant 0 : i32
    return %arg2, %arg1 : i32, i32
  }
  func.func @transform_4(%arg0: i32, %arg1: i32, %arg2: i32) -> (i32, i32) {
    %c0_i32 = arith.constant 0 : i32
    %c0_i32_0 = arith.constant 0 : i32
    return %c0_i32, %arg1 : i32, i32
  }
  func.func @transform_5(%arg0: i32, %arg1: i32, %arg2: i32) -> (i32, i32) {
    %c0_i32 = arith.constant 0 : i32
    %c0_i32_0 = arith.constant 0 : i32
    return %c0_i32, %arg1 : i32, i32
  }
  func.func @transform_6(%arg0: i32, %arg1: i32, %arg2: i32) -> (i32, i32) {
    %c0_i32 = arith.constant 0 : i32
    %c0_i32_0 = arith.constant 0 : i32
    return %c0_i32, %arg1 : i32, i32
  }
  func.func @transform_7(%arg0: i32, %arg1: i32, %arg2: i32) -> (i32, i32) {
    %c0_i32 = arith.constant 0 : i32
    return %arg0, %arg1 : i32, i32
  }
}

</mosaic_0001>

<bundles_post_ra>
// kernel: tpu_custom_call.1
= control target key start
LH: loop header
LB: loop body
LE: loop exit
PB: predicated region body
PF: predicated region fallthrough
CT: control target
= control target key end

     0   :  { %12 = vsyncpa [#allocation5], 0  ;;  %s722_s0 = inlined_call_operand.hbm [shape: f32[8,128], index: 0, kind: input, shape index: {}]   ;;  %s723_s1 = inlined_call_operand.hbm [shape: f32[8,128], index: 1, kind: input, shape index: {}]   ;;  %s724_s2 = inlined_call_operand.hbm [shape: f32[128,128], index: 2, kind: input, shape index: {}]   ;;  %s725_s3 = inlined_call_operand.hbm [shape: f32[128,128], index: 3, kind: input, shape index: {}]   ;;  %s726_s4 = inlined_call_operand.vmem [shape: f32[1,128], index: 4, kind: input, shape index: {}]   ;;  %s727_s5 = inlined_call_operand.vmem [shape: f32[1,128], index: 5, kind: input, shape index: {}]   ;;  %s728_s6 = inlined_call_operand.vmem [shape: f32[1,128], index: 6, kind: input, shape index: {}]   ;;  %s729_s7 = inlined_call_operand.hbm [shape: f32[8,128], index: 7, kind: output, shape index: {}]  }
   0x1   :  { %13 = vsyncpa [#allocation8], 0 }
   0x2   :  { %14 = vsyncpa [#allocation11], 0 }
   0x3   :  { %15 = vsyncpa [#allocation6], 0  ;;  %s587_s24 = smov [#allocation7]   ;;  %s588_s26 = smov [#allocation4]  }
   0x4   :  { %s32_s25 = sshll.u32 %s587_s24, 4  ;;  %s22_s27 = sshll.u32 %s588_s26, 4  ;;  %s33_s25 = int_to_ptr.vmem [resolvable:$true] %s32_s25  ;;  %s23_s27 = int_to_ptr.vmem [resolvable:$true] %s22_s27 }
   0x5   :  { %s469_s30 = scalar_lea.hbm %s723_s1, 128 }
   0x6   :  { %p470_p0 = scmp.ne.s32.totalorder %s723_s1, %s469_s30  ;;  %p473_p1 = scmp.lt.u32.totalorder %s469_s30, %s723_s1 }
   0x8   :  { %p475_p2 = pnand %p473_p1, %p470_p0 }
   0xa   :  { %478 = shalt.err (!%p475_p2)
}
   0xb   :  { %s479_s12 = scalar_lea.vmem %s33_s25, 128  ;;  %p484_p4 = scmp.lt.s32.totalorder %s33_s25, %s33_s25 }
   0xc   :  { %p480_p3 = scmp.ne.s32.totalorder %s33_s25, %s479_s12  ;;  %p485_p5 = scmp.lt.s32.totalorder %s479_s12, %s479_s12 }
   0xe   :  { %p486_p6 = por %p485_p5, %p484_p4 }
  0x10   :  { %p487_p7 = pnand %p486_p6, %p480_p3 }
  0x12   :  { %490 = shalt.err (!%p487_p7)
}
  0x13   :  { %35 = dma.hbm_to_vmem [thread:$0]  %s723_s1, 128, %s33_s25, [#allocation8]  }
  0x14   :  { %s491_s17 = scalar_lea.hbm %s722_s0, 128 }
  0x15   :  { %p492_p8 = scmp.ne.s32.totalorder %s722_s0, %s491_s17  ;;  %p495_p9 = scmp.lt.u32.totalorder %s491_s17, %s722_s0 }
  0x17   :  { %p497_p10 = pnand %p495_p9, %p492_p8 }
  0x19   :  { %500 = shalt.err (!%p497_p10)
}
  0x1a   :  { %s501_s22 = scalar_lea.vmem %s23_s27, 128  ;;  %p506_p12 = scmp.lt.s32.totalorder %s23_s27, %s23_s27 }
  0x1b   :  { %p502_p11 = scmp.ne.s32.totalorder %s23_s27, %s501_s22  ;;  %p507_p13 = scmp.lt.s32.totalorder %s501_s22, %s501_s22 }
  0x1d   :  { %p508_p0 = por %p507_p13, %p506_p12 }
  0x1f   :  { %p509_p1 = pnand %p508_p0, %p502_p11 }
  0x21   :  { %512 = shalt.err (!%p509_p1)
}
  0x22   :  { %25 = dma.hbm_to_vmem [thread:$0]  %s722_s0, 128, %s23_s27, [#allocation5]  }
  0x23   :  { %s589_s24 = smov [#allocation9]   ;;  %s513_s29 = scalar_lea.hbm %s724_s2, 2048 }
  0x24   :  { %s41_s25 = sshll.u32 %s589_s24, 4  ;;  %p514_p2 = scmp.ne.s32.totalorder %s724_s2, %s513_s29  ;;  %s42_s25 = int_to_ptr.vmem [resolvable:$true] %s41_s25 }
  0x25   :  { %p517_p3 = scmp.lt.u32.totalorder %s513_s29, %s724_s2 }
  0x27   :  { %p519_p4 = pnand %p517_p3, %p514_p2 }
  0x29   :  { %522 = shalt.err (!%p519_p4)
}
  0x2a   :  { %s523_s11 = scalar_lea.vmem %s42_s25, 2048  ;;  %p528_p6 = scmp.lt.s32.totalorder %s42_s25, %s42_s25 }
  0x2b   :  { %p524_p5 = scmp.ne.s32.totalorder %s42_s25, %s523_s11  ;;  %p529_p7 = scmp.lt.s32.totalorder %s523_s11, %s523_s11 }
  0x2d   :  { %p530_p8 = por %p529_p7, %p528_p6 }
  0x2f   :  { %p531_p9 = pnand %p530_p8, %p524_p5 }
  0x31   :  { %534 = shalt.err (!%p531_p9)
}
  0x32   :  { %s590_s0 = smov 128   ;;  %s591_s27 = smov 8  }
  0x33   :  { %47 = dma.hbm_to_vmem [thread:$0]  %s724_s2, 2048, %s42_s25, [#allocation8], %s590_s0, %s590_s0, %s591_s27  }
  0x34   :  { %s592_s14 = smov [#allocation10]   ;;  %s535_s18 = scalar_lea.hbm %s725_s3, 2048 }
  0x35   :  { %s53_s15 = sshll.u32 %s592_s14, 4  ;;  %p536_p10 = scmp.ne.s32.totalorder %s725_s3, %s535_s18  ;;  %s54_s15 = int_to_ptr.vmem [resolvable:$true] %s53_s15 }
  0x36   :  { %p539_p11 = scmp.lt.u32.totalorder %s535_s18, %s725_s3 }
  0x38   :  { %p541_p12 = pnand %p539_p11, %p536_p10 }
  0x3a   :  { %544 = shalt.err (!%p541_p12)
}
  0x3b   :  { %s545_s1 = scalar_lea.vmem %s54_s15, 2048  ;;  %p550_p0 = scmp.lt.s32.totalorder %s54_s15, %s54_s15 }
  0x3c   :  { %p546_p13 = scmp.ne.s32.totalorder %s54_s15, %s545_s1  ;;  %p551_p1 = scmp.lt.s32.totalorder %s545_s1, %s545_s1 }
  0x3e   :  { %p552_p2 = por %p551_p1, %p550_p0 }
  0x40   :  { %p553_p3 = pnand %p552_p2, %p546_p13 }
  0x42   :  { %556 = shalt.err (!%p553_p3)
}
  0x43   :  { %59 = dma.hbm_to_vmem [thread:$0]  %s725_s3, 2048, %s54_s15, [#allocation11], %s590_s0, %s590_s0, %s591_s27  }
  0x44   :  { %579 = dma.done.wait [#allocation5], 128  }
  0x45   :  { %580 = vsyncadd [#allocation5], 4294967168 }
  0x46   :  { %581 = dma.done.wait [#allocation8], 2176  }
  0x47   :  { %582 = vsyncadd [#allocation8], 4294965120 }
  0x48   :  { %583 = dma.done.wait [#allocation11], 2048  }
  0x49   :  { %584 = vsyncadd [#allocation11], 4294965248  ;;  %v593_v0 = vmov 0.0|0.0   ;;  %vm594_vm0 = vmmov 0   ;;  %v595_v1 = vmov 0.0   ;;  %v176_v2 = vld [vmem:[#allocation10] sm:$0xff]  ;;  %v275_v52 = vlaneseq }
  0x4a   :  { %435 = vmatprep.subr.bf16.mxu1 %v593_v0  ;;  %411 = vmatprep.subr.bf16.mxu0 %v593_v0  ;;  %v177_v3 = vld [vmem:[#allocation10 + $0x8] sm:$0xff]  ;;  %v86_v4 = vld [vmem:[#allocation9] sm:$0xff]  ;;  %v178_v7 = vld [vmem:[#allocation10 + $0x10] sm:$0xff]  ;;  %s596_s30 = smov [#allocation12]  }
  0x4b   :  { %408 = vmatprep.mubr.msk.f32.mxu1 %vm594_vm0, %v595_v1  ;;  %373 = vmatprep.mubr.msk.f32.mxu0 %vm594_vm0, %v595_v1  ;;  %v436_v5 = vpack.c.bf16 %v177_v3, %v176_v2  ;;  %v87_v6 = vld [vmem:[#allocation9 + $0x8] sm:$0xff]  ;;  %v179_v8 = vld [vmem:[#allocation10 + $0x18] sm:$0xff]  ;;  %v88_v10 = vld [vmem:[#allocation9 + $0x10] sm:$0xff]  ;;  %v276_v53 = vshrl.u32 %v275_v52, 7 }
  0x4c   :  { %v412_v9 = vpack.c.bf16 %v87_v6, %v86_v4  ;;  %v89_v11 = vld [vmem:[#allocation9 + $0x18] sm:$0xff]  ;;  %v439_v12 = vpack.c.bf16 %v179_v8, %v178_v7  ;;  %v180_v14 = vld [vmem:[#allocation10 + $0x20] sm:$0xff]  ;;  %v181_v15 = vld [vmem:[#allocation10 + $0x28] sm:$0xff] }
  0x4d   :  { %437 = vmatpush3.bf16.msra.mxu1 %v436_v5  ;;  %v415_v13 = vpack.c.bf16 %v89_v11, %v88_v10  ;;  %v90_v16 = vld [vmem:[#allocation9 + $0x20] sm:$0xff]  ;;  %v91_v17 = vld [vmem:[#allocation9 + $0x28] sm:$0xff]  ;;  %v442_v18 = vpack.c.bf16 %v181_v15, %v180_v14  ;;  %v182_v20 = vld [vmem:[#allocation10 + $0x30] sm:$0xff]  ;;  %v277_v57 = vsub.s32 0, %v276_v53 }
  0x4e   :  { %413 = vmatpush3.bf16.msra.mxu0 %v412_v9  ;;  %438 = vmatprep.subr.bf16.mxu1 %v593_v0  ;;  %v418_v19 = vpack.c.bf16 %v91_v17, %v90_v16  ;;  %v183_v21 = vld [vmem:[#allocation10 + $0x38] sm:$0xff]  ;;  %v92_v22 = vld [vmem:[#allocation9 + $0x30] sm:$0xff]  ;;  %v184_v26 = vld [vmem:[#allocation10 + $0x40] sm:$0xff] }
  0x4f   :  { %414 = vmatprep.subr.bf16.mxu0 %v593_v0  ;;  %v93_v23 = vld [vmem:[#allocation9 + $0x38] sm:$0xff]  ;;  %v445_v24 = vpack.c.bf16 %v183_v21, %v182_v20  ;;  %v185_v27 = vld [vmem:[#allocation10 + $0x48] sm:$0xff]  ;;  %v94_v28 = vld [vmem:[#allocation9 + $0x40] sm:$0xff] }
  0x50   :  { %v421_v25 = vpack.c.bf16 %v93_v23, %v92_v22  ;;  %v95_v29 = vld [vmem:[#allocation9 + $0x48] sm:$0xff]  ;;  %v448_v30 = vpack.c.bf16 %v185_v27, %v184_v26  ;;  %v186_v32 = vld [vmem:[#allocation10 + $0x50] sm:$0xff]  ;;  %v187_v33 = vld [vmem:[#allocation10 + $0x58] sm:$0xff] }
  0x51   :  { %440 = vmatpush3.bf16.msra.mxu1 %v439_v12  ;;  %v424_v31 = vpack.c.bf16 %v95_v29, %v94_v28  ;;  %v96_v34 = vld [vmem:[#allocation9 + $0x50] sm:$0xff]  ;;  %v97_v35 = vld [vmem:[#allocation9 + $0x58] sm:$0xff]  ;;  %v451_v36 = vpack.c.bf16 %v187_v33, %v186_v32  ;;  %v188_v38 = vld [vmem:[#allocation10 + $0x60] sm:$0xff] }
  0x52   :  { %416 = vmatpush3.bf16.msra.mxu0 %v415_v13  ;;  %441 = vmatprep.subr.bf16.mxu1 %v593_v0  ;;  %v427_v37 = vpack.c.bf16 %v97_v35, %v96_v34  ;;  %v189_v39 = vld [vmem:[#allocation10 + $0x68] sm:$0xff]  ;;  %v98_v40 = vld [vmem:[#allocation9 + $0x60] sm:$0xff]  ;;  %v190_v44 = vld [vmem:[#allocation10 + $0x70] sm:$0xff] }
  0x53   :  { %417 = vmatprep.subr.bf16.mxu0 %v593_v0  ;;  %v99_v41 = vld [vmem:[#allocation9 + $0x68] sm:$0xff]  ;;  %v454_v42 = vpack.c.bf16 %v189_v39, %v188_v38  ;;  %v191_v45 = vld [vmem:[#allocation10 + $0x78] sm:$0xff]  ;;  %v100_v46 = vld [vmem:[#allocation9 + $0x70] sm:$0xff] }
  0x54   :  { %v430_v43 = vpack.c.bf16 %v99_v41, %v98_v40  ;;  %v101_v47 = vld [vmem:[#allocation9 + $0x78] sm:$0xff]  ;;  %v457_v48 = vpack.c.bf16 %v191_v45, %v190_v44  ;;  %v85_v51 = vld [vmem:[#allocation4] sm:$0xff] }
  0x55   :  { %443 = vmatpush3.bf16.msra.mxu1 %v442_v18  ;;  %v433_v49 = vpack.c.bf16 %v101_v47, %v100_v46  ;;  %v175_v50 = vld [vmem:[#allocation7] sm:$0xff]  ;;  %v267_v54 = vld [vmem:[%s726_s4] sm:$0x1]  ;;  %s296_s4 = sshll.u32 %s596_s30, 4  ;;  %s297_s4 = int_to_ptr.vmem [resolvable:$true] %s296_s4 }
  0x56   :  { %419 = vmatpush3.bf16.msra.mxu0 %v418_v19  ;;  %444 = vmatprep.subr.bf16.mxu1 %v593_v0  ;;  %v269_v55 = vld [vmem:[%s728_s6] sm:$0x1]  ;;  %v278_v59 = vrot.slane %v267_v54, %v277_v57  ;;  %s557_s6 = scalar_lea.vmem %s297_s4, 128  ;;  %p562_p5 = scmp.lt.s32.totalorder %s297_s4, %s297_s4 }
  0x57   :  { %420 = vmatprep.subr.bf16.mxu0 %v593_v0  ;;  %v270_v56 = vmul.f32 %v269_v55, %v267_v54  ;;  %v268_v58 = vld [vmem:[%s727_s5] sm:$0x1]  ;;  %p558_p4 = scmp.ne.s32.totalorder %s297_s4, %s557_s6  ;;  %p563_p6 = scmp.lt.s32.totalorder %s557_s6, %s557_s6 }
  0x59   :  { %446 = vmatpush3.bf16.msra.mxu1 %v445_v24  ;;  %v271_v60 = vadd.f32 %v270_v56, %v268_v58  ;;  %p564_p7 = por %p563_p6, %p562_p5 }
  0x5a   :  { %422 = vmatpush3.bf16.msra.mxu0 %v421_v25  ;;  %447 = vmatprep.subr.bf16.mxu1 %v593_v0 }
  0x5b   :  { %423 = vmatprep.subr.bf16.mxu0 %v593_v0  ;;  %p565_p8 = pnand %p564_p7, %p558_p4 }
  0x5d   :  { %449 = vmatpush3.bf16.msra.mxu1 %v448_v30 }
  0x5e   :  { %425 = vmatpush3.bf16.msra.mxu0 %v424_v31  ;;  %450 = vmatprep.subr.bf16.mxu1 %v593_v0 }
  0x5f   :  { %426 = vmatprep.subr.bf16.mxu0 %v593_v0 }
  0x61   :  { %452 = vmatpush3.bf16.msra.mxu1 %v451_v36 }
  0x62   :  { %428 = vmatpush3.bf16.msra.mxu0 %v427_v37  ;;  %453 = vmatprep.subr.bf16.mxu1 %v593_v0 }
  0x63   :  { %429 = vmatprep.subr.bf16.mxu0 %v593_v0 }
  0x65   :  { %455 = vmatpush3.bf16.msra.mxu1 %v454_v42 }
  0x66   :  { %431 = vmatpush3.bf16.msra.mxu0 %v430_v43  ;;  %456 = vmatprep.subr.bf16.mxu1 %v593_v0 }
  0x67   :  { %432 = vmatprep.subr.bf16.mxu0 %v593_v0  ;;  %v286_v0 = vrot.slane %v271_v60, %v277_v57 }
  0x69   :  { %458 = vmatpush3.bf16.msra.mxu1 %v457_v48 }
  0x6a   :  { %434 = vmatpush3.bf16.msra.mxu0 %v433_v49 }
  0x6c   :  { %409 = vmatmul.mubr.f32.vlgmr.msra.gmra.mrb[0].mxu1 %v175_v50 }
  0x6d   :  { %374 = vmatmul.mubr.f32.vlgmr.msra.gmra.mrb[0].mxu0 %v85_v51 }
 0x13f   :  { %v258_v61 = vpop.f32.mrb[0].mxu1 }
 0x140   :  { %v280_v62 = vmul.f32 %v278_v59, %v258_v61  ;;  %v168_v63 = vpop.f32.mrb[0].mxu0  ;;  %v410_v1 = vpop.f32.mrb[1].mxu1 }
 0x141   :  { %v375_v2 = vpop.f32.mrb[1].mxu0 }
 0x142   :  { %v281_v3 = vadd.f32 %v280_v62, %v168_v63 }
 0x144   :  { %v288_v4 = vadd.f32 %v286_v0, %v281_v3 }
 0x146   :  { %289 = vst [vmem:[#allocation12] sm:$0xff] %v288_v4 }
 0x147   :  { %568 = shalt.err (!%p565_p8)
}
 0x148   :  { %s569_s9 = scalar_lea.hbm %s729_s7, 128 }
 0x149   :  { %p570_p9 = scmp.ne.s32.totalorder %s729_s7, %s569_s9  ;;  %p573_p10 = scmp.lt.u32.totalorder %s569_s9, %s729_s7 }
 0x14b   :  { %p575_p11 = pnand %p573_p10, %p570_p9 }
 0x14d   :  { %578 = shalt.err (!%p575_p11)
}
 0x14e   :  { %299 = dma.vmem_to_hbm [thread:$0]  %s297_s4, 128, %s729_s7, [#allocation6]  }
 0x14f   :  { %585 = dma.done.wait [#allocation6], 128  }
 0x150   :  { %586 = vsyncadd [#allocation6], 4294967168 }
 0x151   :  { %303 = vsyncpa [#allocation5], 1 }
 0x152   :  { %304 = vsyncpa [#allocation8], 1 }
 0x153   :  { %305 = vsyncpa [#allocation11], 1 }
 0x154   :  { %306 = vsyncpa [#allocation6], 1 }

</bundles_post_ra>
